<compile_context>
chip_gen: v6e
topology: v6e:2x2x1
jax: 0.10.0
libtpu: 0.0.40
codegen_flags: <defaults>
</compile_context>

<pallas_src>
import jax
import jax.numpy as jnp
from jax.experimental import pallas as pl
from jax.experimental.pallas import tpu as pltpu

SH_C = 16                        # degree-4 real spherical harmonics -> 16 coefficients
SH0 = 0.28209479177387814        # Y_0^0 constant
C_PAD_SUB = 8                    # 3 output channels padded to 8 sublanes


def _sh_terms(x, y, z):
    # tcnn SphericalHarmonics degree-4 basis (x, y, z already mapped to [-1, 1]).
    xy, yz, xz = x * y, y * z, x * z
    x2, y2, z2 = x * x, y * y, z * z
    return [
        SH0 * jnp.ones_like(x),
        -0.48860251190291987 * y,
        0.48860251190291987 * z,
        -0.48860251190291987 * x,
        1.0925484305920792 * xy,
        -1.0925484305920792 * yz,
        0.94617469575755997 * z2 - 0.31539156525251999,
        -1.0925484305920792 * xz,
        0.54627421529603959 * (x2 - y2),
        0.59004358992664352 * y * (-3.0 * x2 + y2),
        2.8906114426405538 * xy * z,
        0.45704579946446572 * y * (1.0 - 5.0 * z2),
        0.3731763325901154 * z * (5.0 * z2 - 3.0),
        0.45704579946446572 * x * (1.0 - 5.0 * z2),
        1.4453057213202769 * z * (x2 - y2),
        0.59004358992664352 * x * (-x2 + 3.0 * y2),
    ]


def env_model_kernel(dir_ref, w0s_ref, w1_ref, w2_ref, out_ref, sh_ref):
    # dir_ref : (3, T)        directions, points along lanes
    # w0s_ref : (H, 16)       W0 (SH part) transposed; col 0 carries the folded cam bias
    # w1_ref  : (H, H)        W1 transposed
    # w2_ref  : (8, H)        W2 transposed, channel-padded to 8 sublanes
    # out_ref : (8, T)
    # sh_ref  : (16, T)       VMEM scratch holding the SH basis matrix
    dd = 2.0 * dir_ref[...] - 1.0            # (3, T): tcnn SH maps [0,1] -> [-1,1]
    x = dd[0:1, :]
    y = dd[1:2, :]
    z = dd[2:3, :]

    # Build the (16, T) SH basis matrix with 16 static row stores.  Row 0 is the
    # constant term, which together with the bias folded into w0s[:, 0] carries the
    # per-camera feature contribution.
    terms = _sh_terms(x, y, z)
    for k in range(SH_C):
        sh_ref[k:k + 1, :] = terms[k]

    # Input layer on the MXU: (H,16) @ (16,T) -> (H,T), then ReLU.
    h0 = jnp.maximum(
        jnp.dot(w0s_ref[...], sh_ref[...], preferred_element_type=jnp.float32), 0.0)
    h1 = jnp.maximum(
        jnp.dot(w1_ref[...], h0, preferred_element_type=jnp.float32), 0.0)
    logits = jnp.dot(w2_ref[...], h1, preferred_element_type=jnp.float32)   # (8, T)
    out_ref[...] = jax.nn.sigmoid(logits)


def init_params(key, num_cameras, image_features=8, hidden_features=32,
                color_channels=3):
    """Deterministic synthetic parameters (module __init__ shapes)."""
    k1, k2, k3, k4 = jax.random.split(key, 4)
    # nn.Parameter(zeros) then normal_(std=1.0)
    feats = jax.random.normal(k1, (num_cameras, image_features), jnp.float32)

    def w(k, shape):  # simple He-like init for the bias-free MLP
        return jax.random.normal(k, shape, jnp.float32) / jnp.sqrt(shape[0])

    w0 = w(k2, (SH_C + image_features, hidden_features))    # encoded-input -> hidden
    w1 = w(k3, (hidden_features, hidden_features))           # hidden -> hidden (layers=2)
    w2 = w(k4, (hidden_features, color_channels))            # hidden -> output
    return feats, w0, w1, w2


def _choose_tiling(n, tile_target):
    """Pick (tile, steps, n_pad).

    tile is a multiple of 128; steps is even and >= 2 so the single 'parallel'
    grid axis shards and load-balances across both TensorCores on v7x.
    """
    n_ceil = pl.cdiv(n, 128) * 128
    steps = max(2, pl.cdiv(n_ceil, max(128, tile_target)))
    if steps % 2:
        steps += 1
    tile = pl.cdiv(pl.cdiv(n_ceil, steps), 128) * 128
    tile = max(tile, 128)
    return tile, steps, tile * steps


def environment_model_forward(dirs, cam_idx, params, *, tile=8192):
    """dirs: (N, 3) in [0,1] (tcnn SH convention); cam_idx: python int."""
    feats, w0, w1, w2 = params
    N = dirs.shape[0]
    H = w1.shape[0]
    C = w2.shape[1]

    # --- wrapper-side weight prep (tiny, done once per call) -------------------
    cam_feature = feats[cam_idx][None, :]                  # (1, F)
    w0_sh, w0_feat = w0[:SH_C], w0[SH_C:]                  # (16, H), (F, H)
    bias = (cam_feature @ w0_feat)[0]                      # (H,) same for every point
    w0_shT = jnp.transpose(w0_sh)                          # (H, 16)
    w0_shT = w0_shT.at[:, 0].add(bias / SH0)               # fold bias into SH0 column

    w1_T = jnp.transpose(w1)                               # (H, H)
    w2_T = jnp.zeros((C_PAD_SUB, H), jnp.float32).at[:C, :].set(jnp.transpose(w2))

    # --- layout plumbing: points along the lane axis ----------------------------
    tile, steps, n_pad = _choose_tiling(N, tile)
    dirs_T = jnp.pad(jnp.transpose(dirs.astype(jnp.float32)),
                     ((0, 0), (0, n_pad - N)))             # (3, n_pad)

    out = pl.pallas_call(
        env_model_kernel,
        out_shape=jax.ShapeDtypeStruct((C_PAD_SUB, n_pad), jnp.float32),
        grid_spec=pltpu.PrefetchScalarGridSpec(
            num_scalar_prefetch=0,
            grid=(steps,),
            in_specs=[
                pl.BlockSpec((3, tile), lambda i: (0, i)),          # dirs tile
                pl.BlockSpec((H, SH_C), lambda i: (0, 0)),          # W0 (SH, transposed)
                pl.BlockSpec((H, H), lambda i: (0, 0)),             # W1 (transposed)
                pl.BlockSpec((C_PAD_SUB, H), lambda i: (0, 0)),     # W2 (transposed, padded)
            ],
            out_specs=pl.BlockSpec((C_PAD_SUB, tile), lambda i: (0, i)),
            scratch_shapes=[pltpu.VMEM((SH_C, tile), jnp.float32)],
        ),
        compiler_params=pltpu.CompilerParams(dimension_semantics=("parallel",)),
    )(dirs_T, w0_shT, w1_T, w2_T)

    # slice away channel / point padding and restore (N, 3) row-major
    return jnp.transpose(out[:C, :N]).astype(jnp.float32)


def reference_forward(dirs, cam_idx, params):
    """Pure-JAX reference for correctness checking (row-major, no folding)."""
    feats, w0, w1, w2 = params
    d = dirs.astype(jnp.float32)
    x, y, z = (2.0 * d[:, 0:1] - 1.0, 2.0 * d[:, 1:2] - 1.0, 2.0 * d[:, 2:3] - 1.0)
    sh = jnp.concatenate(_sh_terms(x, y, z), axis=1)                  # (N, 16)
    cam = jnp.broadcast_to(feats[cam_idx][None, :], (d.shape[0], feats.shape[1]))
    enc = jnp.concatenate([sh, cam], axis=1)                          # (N, 16+F)
    h0 = jnp.maximum(enc @ w0, 0.0)
    h1 = jnp.maximum(h0 @ w1, 0.0)
    return jax.nn.sigmoid(h1 @ w2).astype(jnp.float32)


if __name__ == "__main__":
    key = jax.random.PRNGKey(0)
    k_params, k_dirs = jax.random.split(key)

    num_cameras, image_features, hidden_features = 4, 8, 32
    params = init_params(k_params, num_cameras, image_features, hidden_features)

    N = 256
    raw = jax.random.normal(k_dirs, (N, 3), jnp.float32)
    unit_dirs = raw / jnp.linalg.norm(raw, axis=1, keepdims=True)
    dirs01 = unit_dirs * 0.5 + 0.5          # tcnn SH expects directions in [0,1]
    cam_idx = 2

    out = environment_model_forward(dirs01, cam_idx, params)
    out = jax.block_until_ready(out)

    ref = reference_forward(dirs01, cam_idx, params)
    assert out.shape == (N, 3) and out.dtype == jnp.float32
    assert jnp.allclose(out, ref, atol=1e-5, rtol=1e-5)
    print("KERNEL_OK")
</pallas_src>

<mosaic_0001>
module attributes {stable_mosaic.version = 11 : i64} {
  func.func @env_model_kernel(%arg0: i32, %arg1: memref<3x128xf32, #tpu.memory_space<vmem>>, %arg2: memref<32x16xf32, #tpu.memory_space<vmem>>, %arg3: memref<32x32xf32, #tpu.memory_space<vmem>>, %arg4: memref<8x32xf32, #tpu.memory_space<vmem>>, %arg5: memref<8x128xf32, #tpu.memory_space<vmem>>, %arg6: memref<16x128xf32, #tpu.memory_space<vmem>>) attributes {dimension_semantics = [#tpu.dimension_semantics<parallel>], iteration_bounds = array<i64: 2>, scalar_prefetch = 0 : i64, scratch_operands = 1 : i64, tpu.core_type = #tpu.core_type<tc>, window_params = [{transform_indices = @transform_0, window_bounds = array<i64: 3, 128>}, {pipeline_mode = #tpu.pipeline_mode<synchronous>, transform_indices = @transform_1, window_bounds = array<i64: 32, 16>}, {pipeline_mode = #tpu.pipeline_mode<synchronous>, transform_indices = @transform_2, window_bounds = array<i64: 32, 32>}, {pipeline_mode = #tpu.pipeline_mode<synchronous>, transform_indices = @transform_3, window_bounds = array<i64: 8, 32>}, {transform_indices = @transform_4, window_bounds = array<i64: 8, 128>}]} {
    %c0 = arith.constant 0 : index
    %c0_0 = arith.constant 0 : index
    %0 = vector.load %arg1[%c0, %c0_0] : memref<3x128xf32, #tpu.memory_space<vmem>>, vector<3x128xf32>
    %cst = arith.constant 2.000000e+00 : f32
    %1 = vector.broadcast %cst : f32 to vector<3x128xf32>
    %2 = arith.mulf %1, %0 : vector<3x128xf32>
    %cst_1 = arith.constant 1.000000e+00 : f32
    %3 = vector.broadcast %cst_1 : f32 to vector<3x128xf32>
    %4 = arith.subf %2, %3 : vector<3x128xf32>
    %5 = vector.extract_strided_slice %4 {offsets = [0, 0], sizes = [1, 128], strides = [1, 1]} : vector<3x128xf32> to vector<1x128xf32>
    %6 = vector.extract_strided_slice %4 {offsets = [1, 0], sizes = [1, 128], strides = [1, 1]} : vector<3x128xf32> to vector<1x128xf32>
    %7 = vector.extract_strided_slice %4 {offsets = [2, 0], sizes = [1, 128], strides = [1, 1]} : vector<3x128xf32> to vector<1x128xf32>
    %8 = arith.mulf %5, %6 : vector<1x128xf32>
    %9 = arith.mulf %6, %7 : vector<1x128xf32>
    %10 = arith.mulf %5, %7 : vector<1x128xf32>
    %11 = arith.mulf %5, %5 : vector<1x128xf32>
    %12 = arith.mulf %6, %6 : vector<1x128xf32>
    %13 = arith.mulf %7, %7 : vector<1x128xf32>
    %cst_2 = arith.constant 1.000000e+00 : f32
    %14 = vector.broadcast %cst_2 : f32 to vector<1x128xf32>
    %cst_3 = arith.constant 0.282094806 : f32
    %15 = vector.broadcast %cst_3 : f32 to vector<1x128xf32>
    %16 = arith.mulf %15, %14 : vector<1x128xf32>
    %cst_4 = arith.constant -0.488602519 : f32
    %17 = vector.broadcast %cst_4 : f32 to vector<1x128xf32>
    %18 = arith.mulf %17, %6 : vector<1x128xf32>
    %cst_5 = arith.constant 0.488602519 : f32
    %19 = vector.broadcast %cst_5 : f32 to vector<1x128xf32>
    %20 = arith.mulf %19, %7 : vector<1x128xf32>
    %cst_6 = arith.constant -0.488602519 : f32
    %21 = vector.broadcast %cst_6 : f32 to vector<1x128xf32>
    %22 = arith.mulf %21, %5 : vector<1x128xf32>
    %cst_7 = arith.constant 1.09254849 : f32
    %23 = vector.broadcast %cst_7 : f32 to vector<1x128xf32>
    %24 = arith.mulf %23, %8 : vector<1x128xf32>
    %cst_8 = arith.constant -1.09254849 : f32
    %25 = vector.broadcast %cst_8 : f32 to vector<1x128xf32>
    %26 = arith.mulf %25, %9 : vector<1x128xf32>
    %cst_9 = arith.constant 0.946174681 : f32
    %27 = vector.broadcast %cst_9 : f32 to vector<1x128xf32>
    %28 = arith.mulf %27, %13 : vector<1x128xf32>
    %cst_10 = arith.constant 0.31539157 : f32
    %29 = vector.broadcast %cst_10 : f32 to vector<1x128xf32>
    %30 = arith.subf %28, %29 : vector<1x128xf32>
    %cst_11 = arith.constant -1.09254849 : f32
    %31 = vector.broadcast %cst_11 : f32 to vector<1x128xf32>
    %32 = arith.mulf %31, %10 : vector<1x128xf32>
    %33 = arith.subf %11, %12 : vector<1x128xf32>
    %cst_12 = arith.constant 0.546274245 : f32
    %34 = vector.broadcast %cst_12 : f32 to vector<1x128xf32>
    %35 = arith.mulf %34, %33 : vector<1x128xf32>
    %cst_13 = arith.constant 0.590043604 : f32
    %36 = vector.broadcast %cst_13 : f32 to vector<1x128xf32>
    %37 = arith.mulf %36, %6 : vector<1x128xf32>
    %cst_14 = arith.constant -3.000000e+00 : f32
    %38 = vector.broadcast %cst_14 : f32 to vector<1x128xf32>
    %39 = arith.mulf %38, %11 : vector<1x128xf32>
    %40 = arith.addf %39, %12 : vector<1x128xf32>
    %41 = arith.mulf %37, %40 : vector<1x128xf32>
    %cst_15 = arith.constant 2.89061141 : f32
    %42 = vector.broadcast %cst_15 : f32 to vector<1x128xf32>
    %43 = arith.mulf %42, %8 : vector<1x128xf32>
    %44 = arith.mulf %43, %7 : vector<1x128xf32>
    %cst_16 = arith.constant 0.457045794 : f32
    %45 = vector.broadcast %cst_16 : f32 to vector<1x128xf32>
    %46 = arith.mulf %45, %6 : vector<1x128xf32>
    %cst_17 = arith.constant 5.000000e+00 : f32
    %47 = vector.broadcast %cst_17 : f32 to vector<1x128xf32>
    %48 = arith.mulf %47, %13 : vector<1x128xf32>
    %cst_18 = arith.constant 1.000000e+00 : f32
    %49 = vector.broadcast %cst_18 : f32 to vector<1x128xf32>
    %50 = arith.subf %49, %48 : vector<1x128xf32>
    %51 = arith.mulf %46, %50 : vector<1x128xf32>
    %cst_19 = arith.constant 0.373176336 : f32
    %52 = vector.broadcast %cst_19 : f32 to vector<1x128xf32>
    %53 = arith.mulf %52, %7 : vector<1x128xf32>
    %cst_20 = arith.constant 5.000000e+00 : f32
    %54 = vector.broadcast %cst_20 : f32 to vector<1x128xf32>
    %55 = arith.mulf %54, %13 : vector<1x128xf32>
    %cst_21 = arith.constant 3.000000e+00 : f32
    %56 = vector.broadcast %cst_21 : f32 to vector<1x128xf32>
    %57 = arith.subf %55, %56 : vector<1x128xf32>
    %58 = arith.mulf %53, %57 : vector<1x128xf32>
    %cst_22 = arith.constant 0.457045794 : f32
    %59 = vector.broadcast %cst_22 : f32 to vector<1x128xf32>
    %60 = arith.mulf %59, %5 : vector<1x128xf32>
    %cst_23 = arith.constant 5.000000e+00 : f32
    %61 = vector.broadcast %cst_23 : f32 to vector<1x128xf32>
    %62 = arith.mulf %61, %13 : vector<1x128xf32>
    %cst_24 = arith.constant 1.000000e+00 : f32
    %63 = vector.broadcast %cst_24 : f32 to vector<1x128xf32>
    %64 = arith.subf %63, %62 : vector<1x128xf32>
    %65 = arith.mulf %60, %64 : vector<1x128xf32>
    %cst_25 = arith.constant 1.44530571 : f32
    %66 = vector.broadcast %cst_25 : f32 to vector<1x128xf32>
    %67 = arith.mulf %66, %7 : vector<1x128xf32>
    %68 = arith.subf %11, %12 : vector<1x128xf32>
    %69 = arith.mulf %67, %68 : vector<1x128xf32>
    %cst_26 = arith.constant 0.590043604 : f32
    %70 = vector.broadcast %cst_26 : f32 to vector<1x128xf32>
    %71 = arith.mulf %70, %5 : vector<1x128xf32>
    %cst_27 = arith.constant 0.000000e+00 : f32
    %72 = vector.broadcast %cst_27 : f32 to vector<1x128xf32>
    %73 = arith.subf %72, %11 : vector<1x128xf32>
    %cst_28 = arith.constant 3.000000e+00 : f32
    %74 = vector.broadcast %cst_28 : f32 to vector<1x128xf32>
    %75 = arith.mulf %74, %12 : vector<1x128xf32>
    %76 = arith.addf %73, %75 : vector<1x128xf32>
    %77 = arith.mulf %71, %76 : vector<1x128xf32>
    %c0_29 = arith.constant 0 : index
    %c0_30 = arith.constant 0 : index
    %78 = vector.load %arg6[%c0_29, %c0_30] : memref<16x128xf32, #tpu.memory_space<vmem>>, vector<1x128xf32>
    tpu.vector_store %arg6[%c0_29, %c0_30], %16 {strides = array<i32>} : memref<16x128xf32, #tpu.memory_space<vmem>>, vector<1x128xf32>,
    %c1 = arith.constant 1 : index
    %c0_31 = arith.constant 0 : index
    %79 = vector.load %arg6[%c1, %c0_31] : memref<16x128xf32, #tpu.memory_space<vmem>>, vector<1x128xf32>
    tpu.vector_store %arg6[%c1, %c0_31], %18 {strides = array<i32>} : memref<16x128xf32, #tpu.memory_space<vmem>>, vector<1x128xf32>,
    %c2 = arith.constant 2 : index
    %c0_32 = arith.constant 0 : index
    %80 = vector.load %arg6[%c2, %c0_32] : memref<16x128xf32, #tpu.memory_space<vmem>>, vector<1x128xf32>
    tpu.vector_store %arg6[%c2, %c0_32], %20 {strides = array<i32>} : memref<16x128xf32, #tpu.memory_space<vmem>>, vector<1x128xf32>,
    %c3 = arith.constant 3 : index
    %c0_33 = arith.constant 0 : index
    %81 = vector.load %arg6[%c3, %c0_33] : memref<16x128xf32, #tpu.memory_space<vmem>>, vector<1x128xf32>
    tpu.vector_store %arg6[%c3, %c0_33], %22 {strides = array<i32>} : memref<16x128xf32, #tpu.memory_space<vmem>>, vector<1x128xf32>,
    %c4 = arith.constant 4 : index
    %c0_34 = arith.constant 0 : index
    %82 = vector.load %arg6[%c4, %c0_34] : memref<16x128xf32, #tpu.memory_space<vmem>>, vector<1x128xf32>
    tpu.vector_store %arg6[%c4, %c0_34], %24 {strides = array<i32>} : memref<16x128xf32, #tpu.memory_space<vmem>>, vector<1x128xf32>,
    %c5 = arith.constant 5 : index
    %c0_35 = arith.constant 0 : index
    %83 = vector.load %arg6[%c5, %c0_35] : memref<16x128xf32, #tpu.memory_space<vmem>>, vector<1x128xf32>
    tpu.vector_store %arg6[%c5, %c0_35], %26 {strides = array<i32>} : memref<16x128xf32, #tpu.memory_space<vmem>>, vector<1x128xf32>,
    %c6 = arith.constant 6 : index
    %c0_36 = arith.constant 0 : index
    %84 = vector.load %arg6[%c6, %c0_36] : memref<16x128xf32, #tpu.memory_space<vmem>>, vector<1x128xf32>
    tpu.vector_store %arg6[%c6, %c0_36], %30 {strides = array<i32>} : memref<16x128xf32, #tpu.memory_space<vmem>>, vector<1x128xf32>,
    %c7 = arith.constant 7 : index
    %c0_37 = arith.constant 0 : index
    %85 = vector.load %arg6[%c7, %c0_37] : memref<16x128xf32, #tpu.memory_space<vmem>>, vector<1x128xf32>
    tpu.vector_store %arg6[%c7, %c0_37], %32 {strides = array<i32>} : memref<16x128xf32, #tpu.memory_space<vmem>>, vector<1x128xf32>,
    %c8 = arith.constant 8 : index
    %c0_38 = arith.constant 0 : index
    %86 = vector.load %arg6[%c8, %c0_38] : memref<16x128xf32, #tpu.memory_space<vmem>>, vector<1x128xf32>
    tpu.vector_store %arg6[%c8, %c0_38], %35 {strides = array<i32>} : memref<16x128xf32, #tpu.memory_space<vmem>>, vector<1x128xf32>,
    %c9 = arith.constant 9 : index
    %c0_39 = arith.constant 0 : index
    %87 = vector.load %arg6[%c9, %c0_39] : memref<16x128xf32, #tpu.memory_space<vmem>>, vector<1x128xf32>
    tpu.vector_store %arg6[%c9, %c0_39], %41 {strides = array<i32>} : memref<16x128xf32, #tpu.memory_space<vmem>>, vector<1x128xf32>,
    %c10 = arith.constant 10 : index
    %c0_40 = arith.constant 0 : index
    %88 = vector.load %arg6[%c10, %c0_40] : memref<16x128xf32, #tpu.memory_space<vmem>>, vector<1x128xf32>
    tpu.vector_store %arg6[%c10, %c0_40], %44 {strides = array<i32>} : memref<16x128xf32, #tpu.memory_space<vmem>>, vector<1x128xf32>,
    %c11 = arith.constant 11 : index
    %c0_41 = arith.constant 0 : index
    %89 = vector.load %arg6[%c11, %c0_41] : memref<16x128xf32, #tpu.memory_space<vmem>>, vector<1x128xf32>
    tpu.vector_store %arg6[%c11, %c0_41], %51 {strides = array<i32>} : memref<16x128xf32, #tpu.memory_space<vmem>>, vector<1x128xf32>,
    %c12 = arith.constant 12 : index
    %c0_42 = arith.constant 0 : index
    %90 = vector.load %arg6[%c12, %c0_42] : memref<16x128xf32, #tpu.memory_space<vmem>>, vector<1x128xf32>
    tpu.vector_store %arg6[%c12, %c0_42], %58 {strides = array<i32>} : memref<16x128xf32, #tpu.memory_space<vmem>>, vector<1x128xf32>,
    %c13 = arith.constant 13 : index
    %c0_43 = arith.constant 0 : index
    %91 = vector.load %arg6[%c13, %c0_43] : memref<16x128xf32, #tpu.memory_space<vmem>>, vector<1x128xf32>
    tpu.vector_store %arg6[%c13, %c0_43], %65 {strides = array<i32>} : memref<16x128xf32, #tpu.memory_space<vmem>>, vector<1x128xf32>,
    %c14 = arith.constant 14 : index
    %c0_44 = arith.constant 0 : index
    %92 = vector.load %arg6[%c14, %c0_44] : memref<16x128xf32, #tpu.memory_space<vmem>>, vector<1x128xf32>
    tpu.vector_store %arg6[%c14, %c0_44], %69 {strides = array<i32>} : memref<16x128xf32, #tpu.memory_space<vmem>>, vector<1x128xf32>,
    %c15 = arith.constant 15 : index
    %c0_45 = arith.constant 0 : index
    %93 = vector.load %arg6[%c15, %c0_45] : memref<16x128xf32, #tpu.memory_space<vmem>>, vector<1x128xf32>
    tpu.vector_store %arg6[%c15, %c0_45], %77 {strides = array<i32>} : memref<16x128xf32, #tpu.memory_space<vmem>>, vector<1x128xf32>,
    %c0_46 = arith.constant 0 : index
    %c0_47 = arith.constant 0 : index
    %94 = vector.load %arg2[%c0_46, %c0_47] : memref<32x16xf32, #tpu.memory_space<vmem>>, vector<32x16xf32>
    %c0_48 = arith.constant 0 : index
    %c0_49 = arith.constant 0 : index
    %95 = vector.load %arg6[%c0_48, %c0_49] : memref<16x128xf32, #tpu.memory_space<vmem>>, vector<16x128xf32>
    %cst_50 = arith.constant dense<0.000000e+00> : vector<32x128xf32>
    %96 = tpu.matmul %94, %95, %cst_50 {dimension_numbers = #tpu.dot_dimension_numbers<[1], [0], [0], [1], [0, 0, 1, 1], [], []>} : vector<32x16xf32>, vector<16x128xf32>, vector<32x128xf32> -> vector<32x128xf32>
    %cst_51 = arith.constant 0.000000e+00 : f32
    %97 = vector.broadcast %cst_51 : f32 to vector<32x128xf32>
    %98 = arith.maximumf %96, %97 : vector<32x128xf32>
    %c0_52 = arith.constant 0 : index
    %c0_53 = arith.constant 0 : index
    %99 = vector.load %arg3[%c0_52, %c0_53] : memref<32x32xf32, #tpu.memory_space<vmem>>, vector<32x32xf32>
    %cst_54 = arith.constant dense<0.000000e+00> : vector<32x128xf32>
    %100 = tpu.matmul %99, %98, %cst_54 {dimension_numbers = #tpu.dot_dimension_numbers<[1], [0], [0], [1], [0, 0, 1, 1], [], []>} : vector<32x32xf32>, vector<32x128xf32>, vector<32x128xf32> -> vector<32x128xf32>
    %cst_55 = arith.constant 0.000000e+00 : f32
    %101 = vector.broadcast %cst_55 : f32 to vector<32x128xf32>
    %102 = arith.maximumf %100, %101 : vector<32x128xf32>
    %c0_56 = arith.constant 0 : index
    %c0_57 = arith.constant 0 : index
    %103 = vector.load %arg4[%c0_56, %c0_57] : memref<8x32xf32, #tpu.memory_space<vmem>>, vector<8x32xf32>
    %cst_58 = arith.constant dense<0.000000e+00> : vector<8x128xf32>
    %104 = tpu.matmul %103, %102, %cst_58 {dimension_numbers = #tpu.dot_dimension_numbers<[1], [0], [0], [1], [0, 0, 1, 1], [], []>} : vector<8x32xf32>, vector<32x128xf32>, vector<8x128xf32> -> vector<8x128xf32>
    %105 = arith.negf %104 : vector<8x128xf32>
    %106 = math.exp %105 : vector<8x128xf32>
    %cst_59 = arith.constant 1.000000e+00 : f32
    %107 = vector.broadcast %cst_59 : f32 to vector<8x128xf32>
    %108 = arith.addf %107, %106 : vector<8x128xf32>
    %109 = arith.divf %107, %108 : vector<8x128xf32>
    %c0_60 = arith.constant 0 : index
    %c0_61 = arith.constant 0 : index
    %110 = vector.load %arg5[%c0_60, %c0_61] : memref<8x128xf32, #tpu.memory_space<vmem>>, vector<8x128xf32>
    tpu.vector_store %arg5[%c0_60, %c0_61], %109 {strides = array<i32>} : memref<8x128xf32, #tpu.memory_space<vmem>>, vector<8x128xf32>,
    return
  }
  func.func @transform_0(%arg0: i32) -> (i32, i32) {
    %c0_i32 = arith.constant 0 : i32
    %c0_i32_0 = arith.constant 0 : i32
    return %c0_i32, %arg0 : i32, i32
  }
  func.func @transform_1(%arg0: i32) -> (i32, i32) {
    %c0_i32 = arith.constant 0 : i32
    %c0_i32_0 = arith.constant 0 : i32
    %c0_i32_1 = arith.constant 0 : i32
    return %c0_i32, %c0_i32_0 : i32, i32
  }
  func.func @transform_2(%arg0: i32) -> (i32, i32) {
    %c0_i32 = arith.constant 0 : i32
    %c0_i32_0 = arith.constant 0 : i32
    %c0_i32_1 = arith.constant 0 : i32
    return %c0_i32, %c0_i32_0 : i32, i32
  }
  func.func @transform_3(%arg0: i32) -> (i32, i32) {
    %c0_i32 = arith.constant 0 : i32
    %c0_i32_0 = arith.constant 0 : i32
    %c0_i32_1 = arith.constant 0 : i32
    return %c0_i32, %c0_i32_0 : i32, i32
  }
  func.func @transform_4(%arg0: i32) -> (i32, i32) {
    %c0_i32 = arith.constant 0 : i32
    %c0_i32_0 = arith.constant 0 : i32
    return %c0_i32, %arg0 : i32, i32
  }
}

</mosaic_0001>

<bundles_post_ra>
// kernel: tpu_custom_call.1
= control target key start
LH: loop header
LB: loop body
LE: loop exit
PB: predicated region body
PF: predicated region fallthrough
CT: control target
= control target key end

     0   :  { %9 = vsyncpa [#allocation4], 0  ;;  %s977_s0 = inlined_call_operand.vmem [shape: f32[3,256], index: 0, kind: input, shape index: {}]   ;;  %s978_s1 = inlined_call_operand.vmem [shape: f32[32,16], index: 1, kind: input, shape index: {}]   ;;  %s979_s2 = inlined_call_operand.vmem [shape: f32[32,32], index: 2, kind: input, shape index: {}]   ;;  %s980_s3 = inlined_call_operand.vmem [shape: f32[8,32], index: 3, kind: input, shape index: {}]   ;;  %s981_s4 = inlined_call_operand.hbm [shape: f32[8,256], index: 4, kind: output, shape index: {}]  }
   0x1   :  { %11 = vsyncpa [#allocation4 + $0x1], 0  ;;  %s848_s15 = smov 0   ;;  %s850_s16 = smov 0  }
   0x2   :  { %s852_s17 = smov 0   ;;  %s854_s18 = smov 0  }
   0x3 LB: > { %s869_s19 = sadd.s32 4294967295, %s817_s18   ;;  %s634_s20 = sadd.s32 4294967294, %s817_s18   ;;  %s817_s18 = sphi %s854_s18, %s987_s18   ;;  %s813_s17 = sphi %s852_s17, %s986_s17   ;;  %s809_s16 = sphi %s850_s16, %s985_s16   ;;  %s805_s15 = sphi %s848_s15, %s984_s15  }
   0x4   : > { %s873_s21 = sadd.s32 1, %s817_s18   ;;  %s113_s22 = sadd.s32 1, %s813_s17 }
   0x5   : > { %s110_s23 = ssub.s32 %s817_s18, %s873_s21  ;;  %p123_p0 = scmp.ne.s32.totalorder %s813_s17, %s809_s16 }
   0x6   : > { %p111_p1 = scmp.eq.s32.totalorder %s110_s23, 0  ;;  %p124_p2 = scmp.eq.s32.totalorder %s869_s19, 1 }
   0x7   : > { %p129_p3 = scmp.ne.s32.totalorder %s809_s16, %s805_s15  ;;  %p130_p4 = scmp.eq.s32.totalorder %s634_s20, 1 }
   0x8   : > { %s884_s24 = scalar_select %p111_p1, %s813_s17, %s113_s22  }
   0x9   : > { %p886_p5 = por %p124_p2, %p123_p0  ;;  %p890_p6 = por %p130_p4, %p129_p3 }
   0xa   : > { %p637_p7 = scmp.ge.s32.totalorder %s817_s18, 1  ;;  %p164_p8 = scmp.lt.s32.totalorder %s817_s18, 3 }
   0xc   : > { %p165_p9 = pnand %p637_p7, %p164_p8 }
   0xd   : > { %p189_p10 = scmp.lt.s32.totalorder (!%p165_p9), %s869_s19, 1  ;;  %s654_s9 = sshll.u32 (!%p165_p9), %s869_s19, 7 }
   0xe   : > { %168 = sbr.rel (%p165_p9) target bundleno = 704 (0x2c0), region = 36  ;;  %s942_s14 = scalar_lea.hbm (!%p165_p9), %s981_s4, %s654_s9 }
   0xf   : > { %s822_s23 = smov (!%p165_p9), [#allocation3]  }
  0x10   : > { %s761_s27 = sshll.u32 (!%p165_p9), %s822_s23, 4  ;;  %s762_s27 = int_to_ptr.vmem [resolvable:$false] %s761_s27 }
  0x13   : > { %v266_v0 = vld [vmem:[%s978_s1] sm:$0xff]  ;;  %vm272_vm0 = vcmask 130048   ;;  %v819_v1 = vmov 0.2820948   ;;  %s190_s29 = scalar_select %p189_p10, %s869_s19, 1  ;;  %v267_v47 = vld [vmem:[%s978_s1 + $0x8] sm:$0xff] }
  0x14   : > { %250 = vst [vmem:[#allocation2] sm:$0x1] %v819_v1  ;;  %680 = vmatprep.mubr.msk.f32.mxu0 %vm272_vm0, %v266_v0  ;;  %v268_v48 = vld [vmem:[%s978_s1 + $0x10] sm:$0xff]  ;;  %v269_v49 = vld [vmem:[%s978_s1 + $0x18] sm:$0xff]  ;;  %v374_v50 = vld [vmem:[%s979_s2] sm:$0xff]  ;;  %vm378_vm1 = vcmask 261120  }
  0x15   : > { %s639_s30 = sshll.u32 %s190_s29, 2  ;;  %694 = vmatprep.mubr.msk.f32.mxu1 %vm378_vm1, %v374_v50  ;;  %v375_v59 = vld [vmem:[%s979_s2 + $0x8] sm:$0xff]  ;;  %v376_v60 = vld [vmem:[%s979_s2 + $0x10] sm:$0xff]  ;;  %v377_v61 = vld [vmem:[%s979_s2 + $0x18] sm:$0xff]  ;;  %v820_v62 = vmov 0.0   ;;  %vm821_vm2 = vmmov 0  }
  0x16   : > { %s192_s7 = scalar_lea.vmem %s977_s0, %s639_s30  ;;  %s763_s19 = scalar_lea.vmem %s762_s27, 256 }
  0x17   : > { %v193_v2 = vld [vmem:[%s192_s7] sm:$0x7]  ;;  %s186_s7 = sand.u32 1, %s809_s16  }
  0x18   : > { %v194_v3 = vmul.f32 2.0, %v193_v2  ;;  %s638_s8 = sshll.u32 %s186_s7, 3  ;;  %s562_s20 = scalar_lea.sflag [#allocation4], %s186_s7 }
  0x19   : > { %s188_s10 = scalar_lea.vmem [#allocation3], %s638_s8 }
  0x1a   : > { %v640_v4 = vadd.f32 -1.0, %v194_v3  ;;  %s575_s11 = sshll.u32 %s188_s10, 4  ;;  %s576_s11 = int_to_ptr.vmem [resolvable:$true] %s575_s11 }
  0x1b   : > { %s757_s22 = scalar_lea.vmem %s576_s11, 128  ;;  %p764_p0 = scmp.lt.s32.totalorder %s576_s11, %s762_s27 }
  0x1c   : > { %v197_v5 = vrot.slane %v640_v4, 1  ;;  %v200_v6 = vrot.slane %v640_v4, 2  ;;  %v203_v7 = vmul.f32 %v640_v4, %v640_v4  ;;  %v216_v8 = vmul.f32 0.5900436, %v640_v4  ;;  %p758_p11 = scmp.ne.s32.totalorder %s576_s11, %s757_s22  ;;  %p765_p1 = scmp.lt.s32.totalorder %s763_s19, %s757_s22 }
  0x1d   : > { %v225_v9 = vmul.f32 0.4570458, %v640_v4  ;;  %v232_v10 = vmul.f32 0.37317634, %v640_v4  ;;  %v238_v11 = vmul.f32 1.4453057, %v640_v4 }
  0x1e   : > { %v199_v12 = vmul.f32 %v640_v4, %v197_v5  ;;  %v212_v13 = vrot.slane %v203_v7, 1  ;;  %v217_v14 = vmul.f32 -3.0, %v203_v7  ;;  %v226_v15 = vmul.f32 5.0, %v203_v7  ;;  %p759_p12 = pnand %p758_p11, %p886_p5  ;;  %p766_p2 = por %p765_p1, %p764_p0 }
  0x1f   : > { %v243_v16 = vsub.f32 0.0, %v203_v7  ;;  %v244_v17 = vmul.f32 3.0, %v203_v7  ;;  %v202_v18 = vmul.f32 %v640_v4, %v200_v6  ;;  %v204_v19 = vmul.f32 -0.48860252, %v640_v4 }
  0x20   : > { %v214_v20 = vsub.f32 %v203_v7, %v212_v13  ;;  %v218_v21 = vadd.f32 %v217_v14, %v212_v13  ;;  %v223_v22 = vmul.f32 2.8906114, %v199_v12  ;;  %v227_v23 = vsub.f32 1.0, %v226_v15  ;;  %p760_p13 = pneg %p759_p12 }
  0x21   : > { %v642_v24 = vadd.f32 -3.0, %v226_v15  ;;  %v246_v25 = vrot.slane %v244_v17, 1  ;;  %v205_v26 = vmul.f32 0.48860252, %v640_v4  ;;  %v206_v27 = vmul.f32 1.0925485, %v199_v12 }
  0x22   : > { %251 = vst [vmem:[#allocation2] sm:$0x2] %v204_v19  ;;  %253 = vst [vmem:[#allocation2 + $0x3] sm:$0x1] %v204_v19  ;;  %v215_v28 = vmul.f32 0.54627424, %v214_v20  ;;  %v224_v30 = vmul.f32 %v223_v22, %v200_v6  ;;  %p767_p3 = pnand %p766_p2, %p760_p13 }
  0x23   : > { %v220_v29 = vrot.slane %v218_v21, 7  ;;  %v229_v31 = vrot.slane %v227_v23, 1  ;;  %v234_v32 = vmul.f32 %v642_v24, %v232_v10  ;;  %v235_v33 = vrot.slane %v227_v23, 2  ;;  %252 = vst [vmem:[#allocation2] sm:$0x4] %v205_v26 }
  0x24   : > { %v240_v34 = vrot.slane %v214_v20, 6  ;;  %v248_v35 = vadd.f32 %v246_v25, %v243_v16  ;;  %254 = vst [vmem:[#allocation2 + $0x4] sm:$0x1] %v206_v27  ;;  %258 = vst [vmem:[#allocation2 + $0x8] sm:$0x1] %v215_v28 }
  0x25   : > { %v222_v36 = vmul.f32 %v220_v29, %v216_v8  ;;  %v231_v37 = vmul.f32 %v229_v31, %v225_v9  ;;  %260 = vst [vmem:[#allocation2 + $0xa] sm:$0x1] %v224_v30  ;;  %v207_v38 = vmul.f32 -1.0925485, %v199_v12  ;;  %v208_v39 = vmul.f32 0.9461747, %v203_v7 }
  0x26   : > { %v237_v40 = vmul.f32 %v235_v33, %v225_v9  ;;  %v242_v41 = vmul.f32 %v240_v34, %v238_v11  ;;  %v249_v42 = vmul.f32 %v248_v35, %v216_v8  ;;  %262 = vst [vmem:[#allocation2 + $0xa] sm:$0x4] %v234_v32  ;;  %v210_v43 = vmul.f32 -1.0925485, %v202_v18  ;;  %v480_v7 = vld [vmem:[%s980_s3] sm:$0xff] }
  0x27   : > { %259 = vst [vmem:[#allocation2 + $0x8] sm:$0x2] %v222_v36  ;;  %261 = vst [vmem:[#allocation2 + $0xa] sm:$0x2] %v231_v37  ;;  %v641_v44 = vadd.f32 -0.31539157, %v208_v39 }
  0x28   : > { %255 = vst [vmem:[#allocation2 + $0x4] sm:$0x2] %v207_v38  ;;  %263 = vst [vmem:[#allocation2 + $0xd] sm:$0x1] %v237_v40 }
  0x29   : > { %264 = vst [vmem:[#allocation2 + $0xc] sm:$0x4] %v242_v41  ;;  %265 = vst [vmem:[#allocation2 + $0xf] sm:$0x1] %v249_v42 }
  0x2a   : > { %257 = vst [vmem:[#allocation2 + $0x7] sm:$0x1] %v210_v43  ;;  %256 = vst [vmem:[#allocation2 + $0x4] sm:$0x4] %v641_v44 }
  0x30   : > { %v271_v45 = vld [vmem:[#allocation2 + $0x8] sm:$0xff] }
  0x31   : > { %676 = vmatprep.subr.mxu0 %v271_v45  ;;  %v270_v46 = vld [vmem:[#allocation2] sm:$0xff] }
  0x32   : > { %677 = vmatpush3.msra.mxu0 %v271_v45 }
  0x33   : > { %678 = vmatprep.subr.mxu0 %v270_v46 }
  0x34   : > { %679 = vmatpush3.msra.mxu0 %v270_v46 }
  0x35   : > { %681 = vmatmul.mubr.msk.f32.vlgmr.msra.gmra.mxu0 %vm272_vm0, %v267_v47  ;;  %700 = vmatprep.subr.mxu0 %v820_v62 }
  0x36   : > { %683 = vmatprep.mubr.msk.f32.mxu0 %vm272_vm0, %v268_v48 }
  0x39   : > { %684 = vmatmul.mubr.msk.f32.gmra.mxu0 %vm272_vm0, %v269_v49 }
  0x3a   : > { %708 = vmatprep.mubr.msk.f32.mxu0 %vm821_vm2, %v820_v62 }
  0xf5   : > { %v682_v51 = vpop.f32.mrf.mxu0 }
  0xf6   : > { %v371_v57 = vmax.f32 %v682_v51, 0.0 }
  0xf7   : > { %v351_v52 = vpop.f32.mrf.mxu0 }
  0xf8   : > { %v370_v58 = vmax.f32 %v351_v52, 0.0 }
  0xf9   : > { %v685_v53 = vpop.f32.mrf.mxu0 }
  0xfa   : > { %v373_v54 = vmax.f32 %v685_v53, 0.0 }
  0xfb   : > { %v361_v55 = vpop.f32.mrf.mxu0 }
  0xfc   : > { %v372_v56 = vmax.f32 %v361_v55, 0.0  ;;  %686 = vmatprep.subr.mxu1 %v373_v54 }
  0xfd   : > { %687 = vmatpush3.msra.mxu1 %v373_v54 }
  0xfe   : > { %688 = vmatprep.subr.mxu1 %v372_v56 }
  0xff   : > { %689 = vmatpush3.msra.mxu1 %v372_v56 }
 0x100   : > { %690 = vmatprep.subr.mxu1 %v371_v57 }
 0x101   : > { %691 = vmatpush3.msra.mxu1 %v371_v57 }
 0x102   : > { %692 = vmatprep.subr.mxu1 %v370_v58 }
 0x103   : > { %693 = vmatpush3.msra.mxu1 %v370_v58 }
 0x104   : > { %695 = vmatmul.mubr.msk.f32.vlgmr.msra.gmra.mxu1 %vm378_vm1, %v375_v59 }
 0x105   : > { %697 = vmatprep.mubr.msk.f32.mxu1 %vm378_vm1, %v376_v60 }
 0x108   : > { %698 = vmatmul.mubr.msk.f32.gmra.mxu1 %vm378_vm1, %v377_v61 }
 0x1c4   : > { %v696_v63 = vpop.f32.mrf.mxu1 }
 0x1c5   : > { %v477_v5 = vmax.f32 %v696_v63, 0.0 }
 0x1c6   : > { %v457_v0 = vpop.f32.mrf.mxu1 }
 0x1c7   : > { %v476_v6 = vmax.f32 %v457_v0, 0.0 }
 0x1c8   : > { %v699_v1 = vpop.f32.mrf.mxu1 }
 0x1c9   : > { %v479_v2 = vmax.f32 %v699_v1, 0.0 }
 0x1ca   : > { %v467_v3 = vpop.f32.mrf.mxu1 }
 0x1cb   : > { %v478_v4 = vmax.f32 %v467_v3, 0.0  ;;  %701 = vmatpush3.msra.mxu0 %v479_v2 }
 0x1cc   : > { %702 = vmatprep.subr.mxu0 %v820_v62 }
 0x1cd   : > { %703 = vmatpush3.msra.mxu0 %v478_v4 }
 0x1ce   : > { %704 = vmatprep.subr.mxu0 %v820_v62 }
 0x1cf   : > { %705 = vmatpush3.msra.mxu0 %v477_v5 }
 0x1d0   : > { %706 = vmatprep.subr.mxu0 %v820_v62 }
 0x1d1   : > { %707 = vmatpush3.msra.mxu0 %v476_v6 }
 0x1d2   : > { %709 = vmatmul.mubr.msk.f32.vlgmr.msra.gmra.mxu0 %vm378_vm1, %v480_v7 }
 0x292   : > { %v550_v8 = vpop.f32.mrf.mxu0 }
 0x293   : > { %v652_v9 = vmul.f32 -1.442695, %v550_v8 }
 0x294   : > { %v710_v10 = vpop.f32.mrf.mxu0 }
 0x295   : > { %753 = vpow2.f32 %v652_v9 }
 0x2a2   : > { %v754_v11 = vpop.eup %753 }
 0x2a3   : > { %v557_v12 = vadd.f32 1.0, %v754_v11 }
 0x2a5   : > { %755 = vrcp.f32 %v557_v12 }
 0x2b2   : > { %v756_v13 = vpop.eup %755 }
 0x2b3   : > { %560 = vst [vmem:[%s188_s10] sm:$0xff] %v756_v13 }
 0x2b4   : > { %770 = shalt.err (!%p767_p3)
}
 0x2b5   : > { %s771_s28 = scalar_lea.hbm %s942_s14, 128  ;;  %s775_s5 = scalar_lea.hbm %s981_s4, 256 }
 0x2b6   : > { %p772_p4 = scmp.ne.s32.totalorder %s942_s14, %s771_s28  ;;  %p776_p9 = scmp.lt.s32.totalorder %s942_s14, %s981_s4 }
 0x2b7   : > { %p777_p10 = scmp.lt.s32.totalorder %s775_s5, %s771_s28 }
 0x2b8   : > { %p773_p7 = pnand %p772_p4, %p886_p5 }
 0x2b9   : > { %p778_p11 = por %p777_p10, %p776_p9 }
 0x2ba   : > { %p774_p8 = pneg %p773_p7 }
 0x2bc   : > { %p779_p12 = pnand %p778_p11, %p774_p8 }
 0x2be   : > { %782 = shalt.err (!%p779_p12)
}
 0x2bf   : > { %711 = dma.vmem_to_hbm [thread:$0]  (%p886_p5), %s576_s11, 128, %s942_s14, %s562_s20  }
 0x2c0 PF: > { %p717_p13 = scmp.ge.s32.totalorder %s817_s18, 2  ;;  %s587_s8 = sand.u32 1, %s805_s15  }
 0x2c1   : > { %s588_s9 = scalar_lea.sflag [#allocation4], %s587_s8 }
 0x2c2   : > { %p714_p0 = pnand %p717_p13, %p890_p6 }
 0x2c4   : > { %p715_p1 = pneg %p714_p0 }
 0x2c6   : > { %800 = dma.done.wait (%p715_p1), %s588_s9, 128  }
 0x2c7   : > { %802 = vsyncadd (%p715_p1), %s588_s9, 4294967168  ;;  %p14_p2 = scmp.ge.s32.totalorder %s873_s21, 4   ;;  %s984_s15 = smov %s809_s16 }
 0x2c8   : > { %s985_s16 = smov %s813_s17  ;;  %s986_s17 = smov %s884_s24 }
 0x2c9   : > { %s987_s18 = smov %s873_s21  ;;  %16 = sbr.rel (!%p14_p2) target bundleno = 3 (0x3), region = 71 }
 0x2ce   :  { %593 = vsyncpa [#allocation4], 1 }
 0x2cf   :  { %595 = vsyncpa [#allocation4 + $0x1], 1 }

</bundles_post_ra>
